<compile_context>
chip_gen: v7x
topology: tpu7x:2x2x1
jax: 0.10.0
libtpu: 0.0.40
codegen_flags: <defaults>
</compile_context>

<pallas_src>
import jax
import jax.numpy as jnp
from jax.experimental import pallas as pl
from jax.experimental.pallas import tpu as pltpu


def _classifier_kernel(x_ref, w_ref, o_ref):
    """One batch tile: o[0, :] = sum_h x[:, h] * w[0, h].

    x_ref: (TB, H) tile in its native dtype (streamed / double-buffered).
    w_ref: (1, H) f32 weight row (grid-invariant, VMEM-resident).
    o_ref: (1, TB) f32 lane-dense output row.
    """
    x = x_ref[...]                                    # (TB, H), native dtype
    w = w_ref[...].astype(x.dtype)                    # (1, H), broadcast rows
    prod = x * w                                      # VPU elementwise
    acc = jnp.sum(prod, axis=-1, dtype=jnp.float32)   # f32 accumulate, (TB,)
    o_ref[...] = acc.reshape(1, -1)                   # lane-dense (1, TB) store


def _round_up(x, m):
    return ((x + m - 1) // m) * m


def _choose_block_b(batch, feature, itemsize):
    """Batch-tile rows so 2 * TB * H * itemsize stays well under scoped VMEM.

    Target ~8 MiB per (double-buffered) input buffer -> ~16-18 MiB total, which
    fits the smallest scoped-VMEM default across generations (v7x: 32 MiB of
    64 MiB physical; we raise v5e's 16 MiB default via vmem_limit_bytes).
    """
    budget_bytes = 8 * 1024 * 1024
    bb = budget_bytes // max(1, feature * itemsize)
    bb = max(128, min(1024, (bb // 128) * 128))       # lane-dense output tiles
    if batch <= bb:
        return _round_up(max(batch, 1), 8)            # single tile == full array
    return bb


def classifier_forward(pooled_output, weight, *, block_b=None):
    """Linear(H -> 1, bias=False).  pooled_output: [..., H]; weight: [1, H]."""
    orig_shape = pooled_output.shape
    H = orig_shape[-1]
    x2d = pooled_output.reshape(-1, H)
    B = x2d.shape[0]
    itemsize = jnp.dtype(x2d.dtype).itemsize

    if block_b is None:
        block_b = _choose_block_b(B, H, itemsize)
    if B > block_b:
        # Multi-tile grid: tile must satisfy the (8, 128) layout constraints
        # (input second-to-last dim % 8, lane-dense output last dim % 128).
        block_b = max(128, _round_up(block_b, 128))
    else:
        block_b = max(8, _round_up(B, 8))             # single tile

    num_blocks = (B + block_b - 1) // block_b
    b_pad = num_blocks * block_b
    if b_pad != B:
        # Zero-pad the ragged batch tail; padded rows are sliced off below.
        x2d = jnp.pad(x2d, ((0, b_pad - B), (0, 0)))

    # Weight row in f32; grid-invariant so Pallas keeps it resident in VMEM.
    w_row = weight.reshape(1, H).astype(jnp.float32)

    out = pl.pallas_call(
        _classifier_kernel,
        out_shape=jax.ShapeDtypeStruct((1, b_pad), jnp.float32),
        grid_spec=pltpu.PrefetchScalarGridSpec(
            num_scalar_prefetch=0,
            grid=(num_blocks,),
            in_specs=[
                pl.BlockSpec((block_b, H), lambda i: (i, 0)),   # streamed x tiles
                pl.BlockSpec((1, H), lambda i: (0, 0)),         # resident weight
            ],
            out_specs=pl.BlockSpec((1, block_b), lambda i: (0, i)),  # lane-dense
        ),
        compiler_params=pltpu.CompilerParams(
            # Independent batch tiles -> megacore-shardable on v7x (harmless on
            # single-TC v5e/v6e).
            dimension_semantics=("parallel",),
            # Raise v5e's 16 MiB scoped default; matches v6e/v7x defaults.
            vmem_limit_bytes=32 * 1024 * 1024,
        ),
    )(x2d, w_row)

    logits = out.reshape(b_pad)[:B].astype(pooled_output.dtype)
    return logits.reshape(orig_shape[:-1] + (1,))


if __name__ == "__main__":
    key = jax.random.PRNGKey(0)
    kx, kw, kx2 = jax.random.split(key, 3)

    # Small shapes consistent with the module: batch=8, n_embd=32.
    B, H = 8, 32
    pooled_output = jax.random.normal(kx, (B, H), dtype=jnp.float32)
    # nn.Linear weight layout: [out_features=1, in_features=H].
    weight = jax.random.normal(kw, (1, H), dtype=jnp.float32) * 0.02

    logits = classifier_forward(pooled_output, weight)
    jax.block_until_ready(logits)
    ref = jnp.matmul(pooled_output, weight.T,
                     precision=jax.lax.Precision.HIGHEST)
    assert logits.shape == (B, 1)
    assert jnp.allclose(logits, ref, atol=1e-5, rtol=1e-5)

    # Also exercise the multi-tile grid + ragged-tail padding path.
    B2 = 300
    x2 = jax.random.normal(kx2, (B2, H), dtype=jnp.float32)
    logits2 = classifier_forward(x2, weight, block_b=128)
    jax.block_until_ready(logits2)
    ref2 = jnp.matmul(x2, weight.T, precision=jax.lax.Precision.HIGHEST)
    assert logits2.shape == (B2, 1)
    assert jnp.allclose(logits2, ref2, atol=1e-5, rtol=1e-5)

    print("KERNEL_OK")
</pallas_src>

<mosaic_0001>
module attributes {stable_mosaic.version = 11 : i64} {
  func.func @_classifier_kernel(%arg0: i32, %arg1: memref<8x32xf32, #tpu.memory_space<vmem>>, %arg2: memref<1x32xf32, #tpu.memory_space<vmem>>, %arg3: memref<1x8xf32, #tpu.memory_space<vmem>>) attributes {dimension_semantics = [#tpu.dimension_semantics<parallel>], iteration_bounds = array<i64: 1>, scalar_prefetch = 0 : i64, scratch_operands = 0 : i64, tpu.core_type = #tpu.core_type<tc>, window_params = [{transform_indices = @transform_0, window_bounds = array<i64: 8, 32>}, {pipeline_mode = #tpu.pipeline_mode<synchronous>, transform_indices = @transform_1, window_bounds = array<i64: 1, 32>}, {transform_indices = @transform_2, window_bounds = array<i64: 1, 8>}]} {
    %c0 = arith.constant 0 : index
    %c0_0 = arith.constant 0 : index
    %0 = vector.load %arg1[%c0, %c0_0] : memref<8x32xf32, #tpu.memory_space<vmem>>, vector<8x32xf32>
    %c0_1 = arith.constant 0 : index
    %c0_2 = arith.constant 0 : index
    %1 = vector.load %arg2[%c0_1, %c0_2] : memref<1x32xf32, #tpu.memory_space<vmem>>, vector<1x32xf32>
    %2 = vector.broadcast %1 : vector<1x32xf32> to vector<8x32xf32>
    %3 = arith.mulf %0, %2 : vector<8x32xf32>
    %cst = arith.constant dense<0.000000e+00> : vector<8xf32>
    %4 = vector.multi_reduction <add>, %3, %cst [1] : vector<8x32xf32> to vector<8xf32>
    %5 = vector.shape_cast %4 : vector<8xf32> to vector<1x8xf32>
    %c0_3 = arith.constant 0 : index
    %c0_4 = arith.constant 0 : index
    %6 = vector.load %arg3[%c0_3, %c0_4] : memref<1x8xf32, #tpu.memory_space<vmem>>, vector<1x8xf32>
    tpu.vector_store %arg3[%c0_3, %c0_4], %5 {strides = array<i32>} : memref<1x8xf32, #tpu.memory_space<vmem>>, vector<1x8xf32>,
    return
  }
  func.func @transform_0(%arg0: i32) -> (i32, i32) {
    %c0_i32 = arith.constant 0 : i32
    %c0_i32_0 = arith.constant 0 : i32
    return %arg0, %c0_i32 : i32, i32
  }
  func.func @transform_1(%arg0: i32) -> (i32, i32) {
    %c0_i32 = arith.constant 0 : i32
    %c0_i32_0 = arith.constant 0 : i32
    %c0_i32_1 = arith.constant 0 : i32
    return %c0_i32, %c0_i32_0 : i32, i32
  }
  func.func @transform_2(%arg0: i32) -> (i32, i32) {
    %c0_i32 = arith.constant 0 : i32
    %c0_i32_0 = arith.constant 0 : i32
    return %c0_i32, %arg0 : i32, i32
  }
}

</mosaic_0001>

<bundles_post_ra>
// kernel: tpu_custom_call.1
= control target key start
LH: loop header
LB: loop body
LE: loop exit
PB: predicated region body
PF: predicated region fallthrough
CT: control target
= control target key end

     0   :  { %7 = vsyncpa [#allocation3], 0  ;;  %s157_s0 = inlined_call_operand.hbm [shape: f32[8,32], index: 0, kind: input, shape index: {}]   ;;  %s158_s1 = inlined_call_operand.vmem [shape: f32[1,32], index: 1, kind: input, shape index: {}]   ;;  %s159_s2 = inlined_call_operand.hbm [shape: f32[1,8], index: 2, kind: output, shape index: {}]  }
   0x1   :  { %8 = vsyncpa [#allocation4], 0  ;;  %s113_s9 = smov [#allocation2]   ;;  %s65_s13 = scalar_lea.hbm %s157_s0, 128 }
   0x2   :  { %s15_s10 = sshll.u32 %s113_s9, 4  ;;  %p66_p0 = scmp.ne.s32.totalorder %s157_s0, %s65_s13  ;;  %s16_s10 = int_to_ptr.vmem [resolvable:$true] %s15_s10 }
   0x3   :  { %p69_p1 = scmp.lt.u32.totalorder %s65_s13, %s157_s0 }
   0x5   :  { %p71_p2 = pnand %p69_p1, %p66_p0 }
   0x7   :  { %74 = shalt.err (!%p71_p2)
}
   0x8   :  { %s75_s18 = scalar_lea.vmem %s16_s10, 128  ;;  %p80_p4 = scmp.lt.s32.totalorder %s16_s10, %s16_s10 }
   0x9   :  { %p76_p3 = scmp.ne.s32.totalorder %s16_s10, %s75_s18  ;;  %p81_p5 = scmp.lt.s32.totalorder %s75_s18, %s75_s18 }
   0xb   :  { %p82_p6 = por %p81_p5, %p80_p4 }
   0xd   :  { %p83_p7 = pnand %p82_p6, %p76_p3 }
   0xf   :  { %86 = shalt.err (!%p83_p7)
}
  0x10   :  { %18 = dma.hbm_to_vmem [thread:$0]  %s157_s0, 128, %s16_s10, [#allocation3]  }
  0x11   :  { %109 = dma.done.wait [#allocation3], 128  }
  0x12   :  { %110 = vsyncadd [#allocation3], 4294967168  ;;  %v24_v0 = vld [vmem:[#allocation2] sm:$0xff]  ;;  %vm33_vm0 = vcmask 261120   ;;  %v38_v4 = vlaneseq  ;;  %s114_s23 = smov [#allocation5]   ;;  %vm45_vm1 = vcmask 57344  }
  0x13   :  { %v62_v1 = vld [vmem:[%s158_s1] ss:$0 sm:$0xff]  ;;  %s53_s24 = sshll.u32 %s114_s23, 4  ;;  %s54_s24 = int_to_ptr.vmem [resolvable:$true] %s53_s24 }
  0x14   :  { %v32_v2 = vmul.f32 %v62_v1, %v24_v0  ;;  %v39_v5 = vand.u32 127, %v38_v4  ;;  %v41_v6 = vshrl.u32 %v38_v4, 7  ;;  %s87_s0 = scalar_lea.vmem %s54_s24, 16  ;;  %s91_s25 = scalar_lea.vmem %s54_s24, 32 }
  0x15   :  { %p88_p8 = scmp.ne.s32.totalorder %s54_s24, %s87_s0  ;;  %p92_p9 = scmp.lt.s32.totalorder %s54_s24, %s54_s24 }
  0x16   :  { %v34_v3 = vsel %vm33_vm0, %v32_v2, 0.0  ;;  %v42_v7 = vsub.s32 %v39_v5, %v41_v6  ;;  %p93_p10 = scmp.lt.s32.totalorder %s91_s25, %s87_s0 }
  0x17   :  { %35 = vadd.xlane.f32.xlu0 %v34_v3 }
  0x18   :  { %p94_p11 = por %p93_p10, %p92_p9 }
  0x1a   :  { %p95_p12 = pnand %p94_p11, %p88_p8 }
  0xa4   :  { %v36_v8 = vpop.xlane.xlu0 %35 }
  0xa5   :  { %v43_v9 = vrot.slane %v36_v8, %v42_v7 }
  0xa7   :  { %46 = vst.msk [vmem:[#allocation5] sm:$0x1] %vm45_vm1, %v43_v9 }
  0xa8   :  { %98 = shalt.err (!%p95_p12)
}
  0xa9   :  { %s99_s27 = scalar_lea.hbm %s159_s2, 16 }
  0xaa   :  { %p100_p13 = scmp.ne.s32.totalorder %s159_s2, %s99_s27  ;;  %p103_p0 = scmp.lt.u32.totalorder %s99_s27, %s159_s2 }
  0xac   :  { %p105_p1 = pnand %p103_p0, %p100_p13 }
  0xae   :  { %108 = shalt.err (!%p105_p1)
}
  0xaf   :  { %56 = dma.vmem_to_hbm [thread:$0]  %s54_s24, 16, %s159_s2, [#allocation4]  }
  0xb0   :  { %111 = dma.done.wait [#allocation4], 16  }
  0xb1   :  { %112 = vsyncadd [#allocation4], 4294967280 }
  0xb2   :  { %60 = vsyncpa [#allocation3], 1 }
  0xb3   :  { %61 = vsyncpa [#allocation4], 1 }

</bundles_post_ra>
